<compile_context>
chip_gen: v7x
topology: tpu7x:2x2x1
jax: 0.10.0
libtpu: 0.0.40
codegen_flags: <defaults>
</compile_context>

<pallas_src>
import functools

import jax
import jax.numpy as jnp
from jax.experimental import pallas as pl
from jax.experimental.pallas import tpu as pltpu


def _round_up(x, m):
    return ((x + m - 1) // m) * m


def state_embed_kernel(laser_ref, vec_ref, w1_ref, b1_ref, w2_ref, b2_ref,
                       o0_ref, o1_ref, o2_ref, o3_ref, ov_ref, *, matmul_dtype):
    """Fused StateEmbed forward for one row-tile.

    laser_ref : (TM, 360)  raw laser rows (chunk split done here, in VMEM)
    vec_ref   : (TM, V)    raw vector features (only [:, 0:3] used)
    w1/b1     : (90, dim) / (1, dim)
    w2/b2     : (3, dim)  / (1, dim)
    o0..o3    : (TM, dim)  per-chunk laser embeddings (lane-dense)
    ov        : (TM, dim)  vector embedding
    """
    K = w1_ref.shape[0]                                    # 90

    # --- laser branch: 4 chunk dots on the MXU (memory-bound -> underfill ok)
    w1 = w1_ref[...]
    if matmul_dtype is not None:
        w1 = w1.astype(matmul_dtype)
    b1 = b1_ref[...].astype(jnp.float32)

    laser_outs = (o0_ref, o1_ref, o2_ref, o3_ref)
    for g in range(4):                                     # static unroll
        xg = laser_ref[:, g * K:(g + 1) * K]               # in-VMEM slice (TM, 90)
        if matmul_dtype is not None:
            xg = xg.astype(matmul_dtype)
        y = jnp.dot(xg, w1, preferred_element_type=jnp.float32) + b1
        laser_outs[g][...] = jnp.maximum(y, 0.0).astype(laser_outs[g].dtype)

    # --- vector branch: K=3 -> 3 broadcast FMAs on the VPU (f32, v5e-safe) ---
    v = vec_ref[:, 0:3].astype(jnp.float32)                # (TM, 3)
    w2 = w2_ref[...].astype(jnp.float32)                   # (3, dim)
    b2 = b2_ref[...].astype(jnp.float32)                   # (1, dim)
    z = (v[:, 0:1] * w2[0:1, :]
         + v[:, 1:2] * w2[1:2, :]
         + v[:, 2:3] * w2[2:3, :]
         + b2)                                             # (TM, dim) f32
    ov_ref[...] = jnp.maximum(z, 0.0).astype(ov_ref.dtype)


def state_embed(laser_raw, vec_raw, w1, b1, w2, b2, *,
                tm_cap=1024, matmul_dtype=None):
    """Pallas implementation of StateEmbed.forward(states).

    laser_raw: (B, S, 360), vec_raw: (B, S, V>=3)
    w1: (90, dim), b1: (dim,), w2: (3, dim), b2: (dim,)
    Returns list of 5 arrays of shape (B, S, dim).
    """
    B, S = laser_raw.shape[0], laser_raw.shape[1]
    M = B * S
    L = laser_raw.shape[-1]                 # 360
    K = L // 4                              # 90
    dim = w1.shape[1]
    vec3 = vec_raw.reshape(B, S, -1)
    V = vec3.shape[-1]

    assert w1.shape[0] == K and 4 * K == L
    assert w2.shape[0] == 3 and V >= 3
    assert dim % 128 == 0, "dim must be a multiple of 128 (lane-dense stores)"
    assert tm_cap % 8 == 0, "tm_cap must be a multiple of 8 ((8,128) rule)"

    # Collapsing (B, S) -> M keeps the minor dim: layout-compatible, no copy.
    laser2 = laser_raw.reshape(M, L)
    vec2 = vec3.reshape(M, V)
    b1r = b1.reshape(1, dim)
    b2r = b2.reshape(1, dim)

    itemsize = max(jnp.dtype(laser_raw.dtype).itemsize,
                   jnp.dtype(w1.dtype).itemsize)

    def per_buf_bytes(tm):  # one buffer of every block (lane-padded)
        return (tm * _round_up(L, 128) + tm * _round_up(V, 128)
                + _round_up(K, 8) * dim + 3 * 8 * dim
                + 5 * tm * dim) * itemsize

    # Row tile: large (amortize ~0.35us/grid-step), multiple of 8, and chosen
    # so the grid has >= 2 steps where possible (v7x: shard over both TCs).
    TM = min(tm_cap, max(8, _round_up(pl.cdiv(M, 2), 8)))
    VMEM_BUDGET = 44 << 20          # double-buffered working set, safe on v7x
    while TM > 8 and 2 * per_buf_bytes(TM) > VMEM_BUDGET:
        TM = max(8, _round_up(TM // 2, 8))
    grid = (pl.cdiv(M, TM),)

    # Scoped-VMEM limit: v5e default is only 16 MiB; stay under v7x physical.
    vmem_limit = int(min(max(3 * per_buf_bytes(TM), 32 << 20), 48 << 20))

    out_shape = tuple(jax.ShapeDtypeStruct((M, dim), laser_raw.dtype)
                      for _ in range(4)) \
        + (jax.ShapeDtypeStruct((M, dim), vec_raw.dtype),)

    outs = pl.pallas_call(
        functools.partial(state_embed_kernel, matmul_dtype=matmul_dtype),
        out_shape=out_shape,
        grid=grid,
        in_specs=[
            pl.BlockSpec((TM, L), lambda i: (i, 0)),     # laser rows (no host fold)
            pl.BlockSpec((TM, V), lambda i: (i, 0)),     # vector rows
            pl.BlockSpec((K, dim), lambda i: (0, 0)),    # w1 (resident)
            pl.BlockSpec((1, dim), lambda i: (0, 0)),    # b1 (resident)
            pl.BlockSpec((3, dim), lambda i: (0, 0)),    # w2 (resident)
            pl.BlockSpec((1, dim), lambda i: (0, 0)),    # b2 (resident)
        ],
        out_specs=tuple(pl.BlockSpec((TM, dim), lambda i: (i, 0))
                        for _ in range(5)),
        compiler_params=pltpu.CompilerParams(
            dimension_semantics=("parallel",),
            vmem_limit_bytes=vmem_limit),
    )(laser2, vec2, w1, b1r, w2, b2r)

    # Splitting M -> (B, S) with the minor dim unchanged is free (no copy,
    # no strided unbind): each output already is one per-chunk embedding.
    return [o.reshape(B, S, dim) for o in outs]


state_embed_jit = jax.jit(state_embed,
                          static_argnames=("tm_cap", "matmul_dtype"))


def init_params(key, dim=128, dtype=jnp.float32):
    """Deterministic synthetic parameters (PyTorch-Linear-like uniform init)."""
    k1, k2, k3, k4 = jax.random.split(key, 4)

    def lin(kw, kb, fan_in, fan_out):
        bound = 1.0 / jnp.sqrt(jnp.asarray(fan_in, dtype))
        # stored as (in_features, out_features) == PyTorch W transposed once
        w = jax.random.uniform(kw, (fan_in, fan_out), dtype, -bound, bound)
        b = jax.random.uniform(kb, (fan_out,), dtype, -bound, bound)
        return w, b

    return {
        "fc_1d": lin(k1, k2, 90, dim),   # Linear(90, dim) + ReLU
        "fc":    lin(k3, k4, 3, dim),    # Linear(3, dim)  + ReLU
    }


def state_embed_ref(laser_raw, vec_raw, w1, b1, w2, b2):
    """Pure-JAX reference for correctness checking."""
    B, S = laser_raw.shape[0], laser_raw.shape[1]
    M = B * S
    laser = laser_raw.reshape(M, -1)
    K = laser.shape[1] // 4
    outs = []
    for i in range(4):
        chunk = laser[:, i * K:(i + 1) * K]
        y = jnp.maximum(chunk @ w1 + b1, 0.0)
        outs.append(y.reshape(B, S, -1))
    vector = vec_raw.reshape((M,) + vec_raw.shape[2:])[:, 0:3]
    v = jnp.maximum(vector @ w2 + b2, 0.0).reshape(B, S, -1)
    outs.append(v)
    return outs


if __name__ == "__main__":
    B, S, DIM = 2, 8, 128
    key = jax.random.PRNGKey(0)
    k_laser, k_vec, k_params = jax.random.split(key, 3)

    laser_in = jax.random.normal(k_laser, (B, S, 360), jnp.float32)
    vec_in = jax.random.normal(k_vec, (B, S, 5), jnp.float32)

    params = init_params(k_params, dim=DIM)
    w1, b1 = params["fc_1d"]
    w2, b2 = params["fc"]

    outs = state_embed_jit(laser_in, vec_in, w1, b1, w2, b2)
    outs = jax.block_until_ready(outs)

    refs = state_embed_ref(laser_in, vec_in, w1, b1, w2, b2)
    assert len(outs) == 5
    for o, r in zip(outs, refs):
        assert o.shape == (B, S, DIM), o.shape
        assert jnp.allclose(o, r, atol=1e-5, rtol=1e-5), "mismatch vs reference"

    print("KERNEL_OK")
</pallas_src>

<mosaic_0001>
module attributes {stable_mosaic.version = 11 : i64} {
  func.func @state_embed_kernel(%arg0: i32, %arg1: memref<8x360xf32, #tpu.memory_space<vmem>>, %arg2: memref<8x5xf32, #tpu.memory_space<vmem>>, %arg3: memref<90x128xf32, #tpu.memory_space<vmem>>, %arg4: memref<1x128xf32, #tpu.memory_space<vmem>>, %arg5: memref<3x128xf32, #tpu.memory_space<vmem>>, %arg6: memref<1x128xf32, #tpu.memory_space<vmem>>, %arg7: memref<8x128xf32, #tpu.memory_space<vmem>>, %arg8: memref<8x128xf32, #tpu.memory_space<vmem>>, %arg9: memref<8x128xf32, #tpu.memory_space<vmem>>, %arg10: memref<8x128xf32, #tpu.memory_space<vmem>>, %arg11: memref<8x128xf32, #tpu.memory_space<vmem>>) attributes {dimension_semantics = [#tpu.dimension_semantics<parallel>], iteration_bounds = array<i64: 2>, scalar_prefetch = 0 : i64, scratch_operands = 0 : i64, tpu.core_type = #tpu.core_type<tc>, window_params = [{transform_indices = @transform_0, window_bounds = array<i64: 8, 360>}, {transform_indices = @transform_1, window_bounds = array<i64: 8, 5>}, {pipeline_mode = #tpu.pipeline_mode<synchronous>, transform_indices = @transform_2, window_bounds = array<i64: 90, 128>}, {pipeline_mode = #tpu.pipeline_mode<synchronous>, transform_indices = @transform_3, window_bounds = array<i64: 1, 128>}, {pipeline_mode = #tpu.pipeline_mode<synchronous>, transform_indices = @transform_4, window_bounds = array<i64: 3, 128>}, {pipeline_mode = #tpu.pipeline_mode<synchronous>, transform_indices = @transform_5, window_bounds = array<i64: 1, 128>}, {transform_indices = @transform_6, window_bounds = array<i64: 8, 128>}, {transform_indices = @transform_7, window_bounds = array<i64: 8, 128>}, {transform_indices = @transform_8, window_bounds = array<i64: 8, 128>}, {transform_indices = @transform_9, window_bounds = array<i64: 8, 128>}, {transform_indices = @transform_10, window_bounds = array<i64: 8, 128>}]} {
    %c0 = arith.constant 0 : index
    %c0_0 = arith.constant 0 : index
    %0 = vector.load %arg3[%c0, %c0_0] : memref<90x128xf32, #tpu.memory_space<vmem>>, vector<90x128xf32>
    %c0_1 = arith.constant 0 : index
    %c0_2 = arith.constant 0 : index
    %1 = vector.load %arg4[%c0_1, %c0_2] : memref<1x128xf32, #tpu.memory_space<vmem>>, vector<1x128xf32>
    %c0_3 = arith.constant 0 : index
    %c0_4 = arith.constant 0 : index
    %2 = vector.load %arg1[%c0_3, %c0_4] : memref<8x360xf32, #tpu.memory_space<vmem>>, vector<8x90xf32>
    %cst = arith.constant dense<0.000000e+00> : vector<8x128xf32>
    %3 = tpu.matmul %2, %0, %cst {dimension_numbers = #tpu.dot_dimension_numbers<[1], [0], [0], [1], [0, 0, 1, 1], [], []>} : vector<8x90xf32>, vector<90x128xf32>, vector<8x128xf32> -> vector<8x128xf32>
    %4 = vector.broadcast %1 : vector<1x128xf32> to vector<8x128xf32>
    %5 = arith.addf %3, %4 : vector<8x128xf32>
    %cst_5 = arith.constant 0.000000e+00 : f32
    %6 = vector.broadcast %cst_5 : f32 to vector<8x128xf32>
    %7 = arith.maximumf %5, %6 : vector<8x128xf32>
    %c0_6 = arith.constant 0 : index
    %c0_7 = arith.constant 0 : index
    %8 = vector.load %arg7[%c0_6, %c0_7] : memref<8x128xf32, #tpu.memory_space<vmem>>, vector<8x128xf32>
    tpu.vector_store %arg7[%c0_6, %c0_7], %7 {strides = array<i32>} : memref<8x128xf32, #tpu.memory_space<vmem>>, vector<8x128xf32>,
    %c0_8 = arith.constant 0 : index
    %c90 = arith.constant 90 : index
    %9 = vector.load %arg1[%c0_8, %c90] : memref<8x360xf32, #tpu.memory_space<vmem>>, vector<8x90xf32>
    %cst_9 = arith.constant dense<0.000000e+00> : vector<8x128xf32>
    %10 = tpu.matmul %9, %0, %cst_9 {dimension_numbers = #tpu.dot_dimension_numbers<[1], [0], [0], [1], [0, 0, 1, 1], [], []>} : vector<8x90xf32>, vector<90x128xf32>, vector<8x128xf32> -> vector<8x128xf32>
    %11 = vector.broadcast %1 : vector<1x128xf32> to vector<8x128xf32>
    %12 = arith.addf %10, %11 : vector<8x128xf32>
    %cst_10 = arith.constant 0.000000e+00 : f32
    %13 = vector.broadcast %cst_10 : f32 to vector<8x128xf32>
    %14 = arith.maximumf %12, %13 : vector<8x128xf32>
    %c0_11 = arith.constant 0 : index
    %c0_12 = arith.constant 0 : index
    %15 = vector.load %arg8[%c0_11, %c0_12] : memref<8x128xf32, #tpu.memory_space<vmem>>, vector<8x128xf32>
    tpu.vector_store %arg8[%c0_11, %c0_12], %14 {strides = array<i32>} : memref<8x128xf32, #tpu.memory_space<vmem>>, vector<8x128xf32>,
    %c0_13 = arith.constant 0 : index
    %c180 = arith.constant 180 : index
    %16 = vector.load %arg1[%c0_13, %c180] : memref<8x360xf32, #tpu.memory_space<vmem>>, vector<8x90xf32>
    %cst_14 = arith.constant dense<0.000000e+00> : vector<8x128xf32>
    %17 = tpu.matmul %16, %0, %cst_14 {dimension_numbers = #tpu.dot_dimension_numbers<[1], [0], [0], [1], [0, 0, 1, 1], [], []>} : vector<8x90xf32>, vector<90x128xf32>, vector<8x128xf32> -> vector<8x128xf32>
    %18 = vector.broadcast %1 : vector<1x128xf32> to vector<8x128xf32>
    %19 = arith.addf %17, %18 : vector<8x128xf32>
    %cst_15 = arith.constant 0.000000e+00 : f32
    %20 = vector.broadcast %cst_15 : f32 to vector<8x128xf32>
    %21 = arith.maximumf %19, %20 : vector<8x128xf32>
    %c0_16 = arith.constant 0 : index
    %c0_17 = arith.constant 0 : index
    %22 = vector.load %arg9[%c0_16, %c0_17] : memref<8x128xf32, #tpu.memory_space<vmem>>, vector<8x128xf32>
    tpu.vector_store %arg9[%c0_16, %c0_17], %21 {strides = array<i32>} : memref<8x128xf32, #tpu.memory_space<vmem>>, vector<8x128xf32>,
    %c0_18 = arith.constant 0 : index
    %c270 = arith.constant 270 : index
    %23 = vector.load %arg1[%c0_18, %c270] : memref<8x360xf32, #tpu.memory_space<vmem>>, vector<8x90xf32>
    %cst_19 = arith.constant dense<0.000000e+00> : vector<8x128xf32>
    %24 = tpu.matmul %23, %0, %cst_19 {dimension_numbers = #tpu.dot_dimension_numbers<[1], [0], [0], [1], [0, 0, 1, 1], [], []>} : vector<8x90xf32>, vector<90x128xf32>, vector<8x128xf32> -> vector<8x128xf32>
    %25 = vector.broadcast %1 : vector<1x128xf32> to vector<8x128xf32>
    %26 = arith.addf %24, %25 : vector<8x128xf32>
    %cst_20 = arith.constant 0.000000e+00 : f32
    %27 = vector.broadcast %cst_20 : f32 to vector<8x128xf32>
    %28 = arith.maximumf %26, %27 : vector<8x128xf32>
    %c0_21 = arith.constant 0 : index
    %c0_22 = arith.constant 0 : index
    %29 = vector.load %arg10[%c0_21, %c0_22] : memref<8x128xf32, #tpu.memory_space<vmem>>, vector<8x128xf32>
    tpu.vector_store %arg10[%c0_21, %c0_22], %28 {strides = array<i32>} : memref<8x128xf32, #tpu.memory_space<vmem>>, vector<8x128xf32>,
    %c0_23 = arith.constant 0 : index
    %c0_24 = arith.constant 0 : index
    %30 = vector.load %arg2[%c0_23, %c0_24] : memref<8x5xf32, #tpu.memory_space<vmem>>, vector<8x3xf32>
    %c0_25 = arith.constant 0 : index
    %c0_26 = arith.constant 0 : index
    %31 = vector.load %arg5[%c0_25, %c0_26] : memref<3x128xf32, #tpu.memory_space<vmem>>, vector<3x128xf32>
    %c0_27 = arith.constant 0 : index
    %c0_28 = arith.constant 0 : index
    %32 = vector.load %arg6[%c0_27, %c0_28] : memref<1x128xf32, #tpu.memory_space<vmem>>, vector<1x128xf32>
    %33 = vector.extract_strided_slice %30 {offsets = [0, 0], sizes = [8, 1], strides = [1, 1]} : vector<8x3xf32> to vector<8x1xf32>
    %34 = vector.extract_strided_slice %31 {offsets = [0, 0], sizes = [1, 128], strides = [1, 1]} : vector<3x128xf32> to vector<1x128xf32>
    %35 = vector.broadcast %33 : vector<8x1xf32> to vector<8x128xf32>
    %36 = vector.broadcast %34 : vector<1x128xf32> to vector<8x128xf32>
    %37 = arith.mulf %35, %36 : vector<8x128xf32>
    %38 = vector.extract_strided_slice %30 {offsets = [0, 1], sizes = [8, 1], strides = [1, 1]} : vector<8x3xf32> to vector<8x1xf32>
    %39 = vector.extract_strided_slice %31 {offsets = [1, 0], sizes = [1, 128], strides = [1, 1]} : vector<3x128xf32> to vector<1x128xf32>
    %40 = vector.broadcast %38 : vector<8x1xf32> to vector<8x128xf32>
    %41 = vector.broadcast %39 : vector<1x128xf32> to vector<8x128xf32>
    %42 = arith.mulf %40, %41 : vector<8x128xf32>
    %43 = arith.addf %37, %42 : vector<8x128xf32>
    %44 = vector.extract_strided_slice %30 {offsets = [0, 2], sizes = [8, 1], strides = [1, 1]} : vector<8x3xf32> to vector<8x1xf32>
    %45 = vector.extract_strided_slice %31 {offsets = [2, 0], sizes = [1, 128], strides = [1, 1]} : vector<3x128xf32> to vector<1x128xf32>
    %46 = vector.broadcast %44 : vector<8x1xf32> to vector<8x128xf32>
    %47 = vector.broadcast %45 : vector<1x128xf32> to vector<8x128xf32>
    %48 = arith.mulf %46, %47 : vector<8x128xf32>
    %49 = arith.addf %43, %48 : vector<8x128xf32>
    %50 = vector.broadcast %32 : vector<1x128xf32> to vector<8x128xf32>
    %51 = arith.addf %49, %50 : vector<8x128xf32>
    %cst_29 = arith.constant 0.000000e+00 : f32
    %52 = vector.broadcast %cst_29 : f32 to vector<8x128xf32>
    %53 = arith.maximumf %51, %52 : vector<8x128xf32>
    %c0_30 = arith.constant 0 : index
    %c0_31 = arith.constant 0 : index
    %54 = vector.load %arg11[%c0_30, %c0_31] : memref<8x128xf32, #tpu.memory_space<vmem>>, vector<8x128xf32>
    tpu.vector_store %arg11[%c0_30, %c0_31], %53 {strides = array<i32>} : memref<8x128xf32, #tpu.memory_space<vmem>>, vector<8x128xf32>,
    return
  }
  func.func @transform_0(%arg0: i32) -> (i32, i32) {
    %c0_i32 = arith.constant 0 : i32
    %c0_i32_0 = arith.constant 0 : i32
    return %arg0, %c0_i32 : i32, i32
  }
  func.func @transform_1(%arg0: i32) -> (i32, i32) {
    %c0_i32 = arith.constant 0 : i32
    %c0_i32_0 = arith.constant 0 : i32
    return %arg0, %c0_i32 : i32, i32
  }
  func.func @transform_2(%arg0: i32) -> (i32, i32) {
    %c0_i32 = arith.constant 0 : i32
    %c0_i32_0 = arith.constant 0 : i32
    %c0_i32_1 = arith.constant 0 : i32
    return %c0_i32, %c0_i32_0 : i32, i32
  }
  func.func @transform_3(%arg0: i32) -> (i32, i32) {
    %c0_i32 = arith.constant 0 : i32
    %c0_i32_0 = arith.constant 0 : i32
    %c0_i32_1 = arith.constant 0 : i32
    return %c0_i32, %c0_i32_0 : i32, i32
  }
  func.func @transform_4(%arg0: i32) -> (i32, i32) {
    %c0_i32 = arith.constant 0 : i32
    %c0_i32_0 = arith.constant 0 : i32
    %c0_i32_1 = arith.constant 0 : i32
    return %c0_i32, %c0_i32_0 : i32, i32
  }
  func.func @transform_5(%arg0: i32) -> (i32, i32) {
    %c0_i32 = arith.constant 0 : i32
    %c0_i32_0 = arith.constant 0 : i32
    %c0_i32_1 = arith.constant 0 : i32
    return %c0_i32, %c0_i32_0 : i32, i32
  }
  func.func @transform_6(%arg0: i32) -> (i32, i32) {
    %c0_i32 = arith.constant 0 : i32
    %c0_i32_0 = arith.constant 0 : i32
    return %arg0, %c0_i32 : i32, i32
  }
  func.func @transform_7(%arg0: i32) -> (i32, i32) {
    %c0_i32 = arith.constant 0 : i32
    %c0_i32_0 = arith.constant 0 : i32
    return %arg0, %c0_i32 : i32, i32
  }
  func.func @transform_8(%arg0: i32) -> (i32, i32) {
    %c0_i32 = arith.constant 0 : i32
    %c0_i32_0 = arith.constant 0 : i32
    return %arg0, %c0_i32 : i32, i32
  }
  func.func @transform_9(%arg0: i32) -> (i32, i32) {
    %c0_i32 = arith.constant 0 : i32
    %c0_i32_0 = arith.constant 0 : i32
    return %arg0, %c0_i32 : i32, i32
  }
  func.func @transform_10(%arg0: i32) -> (i32, i32) {
    %c0_i32 = arith.constant 0 : i32
    %c0_i32_0 = arith.constant 0 : i32
    return %arg0, %c0_i32 : i32, i32
  }
}

</mosaic_0001>

<bundles_post_ra>
// kernel: state_embed.1
= control target key start
LH: loop header
LB: loop body
LE: loop exit
PB: predicated region body
PF: predicated region fallthrough
CT: control target
= control target key end

     0   :  { %s2268_s0 = inlined_call_operand.hbm [shape: f32[16,360], index: 0, kind: input, shape index: {}]   ;;  %s2269_s1 = inlined_call_operand.vmem [shape: f32[16,5], index: 1, kind: input, shape index: {}]   ;;  %s2270_s2 = inlined_call_operand.hbm [shape: f32[90,128], index: 2, kind: input, shape index: {}]   ;;  %s2271_s3 = inlined_call_operand.vmem [shape: f32[1,128], index: 3, kind: input, shape index: {}]   ;;  %s2272_s4 = inlined_call_operand.vmem [shape: f32[3,128], index: 4, kind: input, shape index: {}]   ;;  %s2273_s5 = inlined_call_operand.vmem [shape: f32[1,128], index: 5, kind: input, shape index: {}]   ;;  %s2274_s6 = inlined_call_operand.hbm [shape: f32[16,128], index: 6, kind: output, shape index: {0}]   ;;  %s2275_s7 = inlined_call_operand.hbm [shape: f32[16,128], index: 7, kind: output, shape index: {1}]   ;;  %s2276_s8 = inlined_call_operand.hbm [shape: f32[16,128], index: 8, kind: output, shape index: {2}]   ;;  %s2277_s9 = inlined_call_operand.hbm [shape: f32[16,128], index: 9, kind: output, shape index: {3}]   ;;  %s2278_s10 = inlined_call_operand.hbm [shape: f32[16,128], index: 10, kind: output, shape index: {4}]  }
   0x1   :  { %2288 = sst [smem:[#allocation22_spill]] %s2270_s2 }
   0x2   :  { %16 = vsyncpa [#allocation3], 0 }
   0x3   :  { %18 = vsyncpa [#allocation3 + $0x1], 0 }
   0x4   :  { %19 = vsyncpa [#allocation6], 0 }
   0x5   :  { %20 = vsyncpa [#allocation4], 0 }
   0x6   :  { %22 = vsyncpa [#allocation4 + $0x1], 0 }
   0x7   :  { %23 = vsyncpa [#allocation9], 0 }
   0x8   :  { %25 = vsyncpa [#allocation9 + $0x1], 0 }
   0x9   :  { %26 = vsyncpa [#allocation12], 0 }
   0xa   :  { %28 = vsyncpa [#allocation12 + $0x1], 0  ;;  %s1822_s13 = smov 0   ;;  %s1824_s14 = smov 0  }
   0xb   :  { %s1826_s15 = smov 0   ;;  %s1828_s16 = smov 0  }
   0xc LB: > { %s1843_s17 = sadd.s32 4294967295, %s1746_s16   ;;  %s2279_s18 = sadd.s32 4294967294, %s1746_s16   ;;  %s1746_s16 = sphi %s1828_s16, %s2312_s16   ;;  %s1742_s15 = sphi %s1826_s15, %s2316_s15   ;;  %s1738_s14 = sphi %s1824_s14, %s2315_s14   ;;  %s1734_s13 = sphi %s1822_s13, %s2314_s13  }
   0xd   : > { %p54_p0 = scmp.ne.s32.totalorder %s1738_s14, %s1734_s13  ;;  %p2282_p1 = scmp.eq.s32.totalorder %s1843_s17, 0 }
   0xe   : > { %p194_p3 = scmp.eq.s32.totalorder %s2279_s18, 1  ;;  %p1132_p5 = scmp.ge.s32.totalorder %s1746_s16, 1 }
   0xf   : > { %p1854_p4 = por %p2282_p1, %p54_p0  ;;  %p305_p7 = scmp.lt.s32.totalorder %s1746_s16, 3 }
  0x10   : > { %p1859_p6 = por %p194_p3, %p54_p0  ;;  %s1748_s22 = smov [#allocation5]  }
  0x11   : > { %s2289_s19 = scalar_select %p1854_p4, 1, 0 }
  0x12   : > { %s2290_s20 = scalar_select %p1859_p6, 1, 0 }
  0x13   : > { %p1864_p8 = pnand %p1132_p5, %p305_p7  ;;  %s317_s23 = sshll.u32 %s1748_s22, 4  ;;  %s1868_s23 = int_to_ptr.vmem [resolvable:$true] %s317_s23 }
  0x14   : > { %2291 = sst [smem:[#allocation19_spill]] %s2290_s20  ;;  %s1880_s25 = sadd.s32 1, %s1746_s16  }
  0x15   : > { %s2292_s21 = scalar_select %p1864_p8, 1, 0 }
  0x16   : > { %p1421_p9 = pneg %p1864_p8  ;;  %2294 = sst [smem:[#allocation20_spill]] %s1880_s25 }
  0x17   : > { %s41_s26 = sadd.s32 1, %s1742_s15  ;;  %s38_s27 = ssub.s32 %s1746_s16, %s1880_s25 }
  0x18   : > { %p1875_p11 = pnand %p1421_p9, %p2282_p1  ;;  %s2295_s2 = sld [smem:[#allocation22_spill]] }
  0x1a   : > { %p1500_p13 = pneg %p1875_p11 }
  0x1e   : > { %s1498_s30 = scalar_lea.hbm %s2295_s2, 1536 }
  0x1f   : > { %p1499_p12 = scmp.ne.s32.totalorder %s2295_s2, %s1498_s30  ;;  %p1505_p5 = scmp.lt.u32.totalorder %s1498_s30, %s2295_s2 }
  0x21   : > { %p1501_p0 = pnand %p1500_p13, %p1499_p12 }
  0x23   : > { %p1502_p3 = pneg %p1501_p0 }
  0x25   : > { %p1507_p7 = pnand %p1505_p5, %p1502_p3 }
  0x27   : > { %1510 = shalt.err (!%p1507_p7)
}
  0x28   : > { %s1511_s25 = scalar_lea.vmem %s1868_s23, 1536  ;;  %p1519_p2 = scmp.lt.s32.totalorder %s1868_s23, %s1868_s23 }
  0x29   : > { %p1512_p9 = scmp.ne.s32.totalorder %s1868_s23, %s1511_s25  ;;  %p1520_p6 = scmp.lt.s32.totalorder %s1511_s25, %s1511_s25 }
  0x2b   : > { %p1514_p10 = pnand %p1512_p9, %p1500_p13  ;;  %p1521_p4 = por %p1520_p6, %p1519_p2 }
  0x2d   : > { %p1515_p1 = pneg %p1514_p10 }
  0x2f   : > { %p1522_p8 = pnand %p1521_p4, %p1515_p1 }
  0x31   : > { %1525 = shalt.err (!%p1522_p8)
}
  0x32   : > { %s1749_s28 = smov 128   ;;  %s1750_s18 = smov 8  }
  0x33   : > { %1424 = dma.hbm_to_vmem [thread:$0]  (!%p1875_p11), %s2295_s2, 1536, %s1868_s23, [#allocation6], %s1749_s28, %s1749_s28, %s1750_s18  }
  0x34   : > { %p39_p2 = scmp.eq.s32.totalorder %s38_s27, 0  ;;  %p48_p1 = scmp.ne.s32.totalorder %s1742_s15, %s1738_s14 }
  0x35   : > { %p49_p4 = scmp.eq.s32.totalorder %s1746_s16, 0  ;;  %p1446_p6 = scmp.lt.s32.totalorder %s1746_s16, 2 }
  0x36   : > { %s1911_s25 = scalar_select %p39_p2, %s1742_s15, %s41_s26  }
  0x37   : > { %p50_p8 = por %p49_p4, %p48_p1  ;;  %p2297_p10 = scmp.eq.s32.totalorder %s1843_s17, 1 }
  0x38   : > { %2296 = sst [smem:[#allocation21_spill]] %s1911_s25  ;;  %s340_s12 = sand.u32 1, %s1742_s15  }
  0x39   : > { %p1915_p12 = por %p2297_p10, %p48_p1  ;;  %s1403_s22 = smul.u32 384, %s1746_s16 }
  0x3a   : > { %s1402_s20 = smul.u32 24, %s340_s12  ;;  %p1921_p13 = pnand %p1446_p6, %p50_p8 }
  0x3b   : > { %s1928_s26 = scalar_lea.hbm %s2268_s0, %s1403_s22  ;;  %s341_s29 = scalar_lea.sflag [#allocation3], %s340_s12 }
  0x3c   : > { %s344_s28 = scalar_lea.vmem [#allocation2], %s1402_s20  ;;  %s1526_s30 = scalar_lea.hbm %s1928_s26, 384 }
  0x3d   : > { %s352_s18 = sshll.u32 %s344_s28, 4  ;;  %p1527_p11 = scmp.ne.s32.totalorder %s1928_s26, %s1526_s30  ;;  %s1930_s18 = int_to_ptr.vmem [resolvable:$true] %s352_s18 }
  0x3e   : > { %p1528_p0 = pneg %p1921_p13  ;;  %s1531_s27 = scalar_lea.hbm %s2268_s0, 768 }
  0x3f   : > { %p1532_p7 = scmp.lt.u32.totalorder %s1928_s26, %s2268_s0  ;;  %p1533_p9 = scmp.lt.u32.totalorder %s1531_s27, %s1526_s30 }
  0x40   : > { %p1529_p3 = pnand %p1528_p0, %p1527_p11  ;;  %p1535_p1 = scmp.lt.u32.totalorder %s1526_s30, %s1928_s26 }
  0x41   : > { %p1534_p2 = por %p1533_p9, %p1532_p7 }
  0x42   : > { %p1530_p5 = pneg %p1529_p3 }
  0x43   : > { %p1536_p4 = por %p1535_p1, %p1534_p2 }
  0x45   : > { %p1537_p6 = pnand %p1536_p4, %p1530_p5 }
  0x47   : > { %1540 = shalt.err (!%p1537_p6)
}
  0x48   : > { %s1541_s20 = scalar_lea.vmem %s1930_s18, 384  ;;  %s1751_s12 = smov [#allocation2]  }
  0x49   : > { %p1542_p8 = scmp.ne.s32.totalorder %s1930_s18, %s1541_s20  ;;  %s1546_s28 = sshll.u32 %s1751_s12, 4  ;;  %s1547_s28 = int_to_ptr.vmem [resolvable:$false] %s1546_s28 }
  0x4a   : > { %s1548_s2 = scalar_lea.vmem %s1547_s28, 768  ;;  %p1549_p3 = scmp.lt.s32.totalorder %s1930_s18, %s1547_s28 }
  0x4b   : > { %p1544_p10 = pnand %p1542_p8, %p1528_p0  ;;  %p1550_p7 = scmp.lt.s32.totalorder %s1548_s2, %s1541_s20 }
  0x4d   : > { %p1545_p11 = pneg %p1544_p10  ;;  %p1551_p9 = por %p1550_p7, %p1549_p3 }
  0x4f   : > { %p1552_p2 = pnand %p1551_p9, %p1545_p11 }
  0x51   : > { %1555 = shalt.err (!%p1552_p2)
}
  0x52   : > { %1428 = dma.hbm_to_vmem [thread:$0]  (!%p1921_p13), %s1928_s26, 384, %s1930_s18, %s341_s29  }
  0x53   : > { %p2300_p5 = scmp.ne.s32.totalorder %s2292_s21, 0 }
  0x54   : > { %s1960_s25 = sand.u32 (!%p2300_p5), 1, %s1738_s14   ;;  %p2301_p0 = scmp.ne.s32.totalorder (!%p2300_p5), %s2289_s19, 0 }
  0x55   : > { %368 = sbr.rel (%p2300_p5) target bundleno = 520 (0x208), region = 44  ;;  %s371_s23 = scalar_lea.sflag (!%p2300_p5), [#allocation3], %s1960_s25 }
  0x56   : > { %s1404_s30 = smul.u32 (!%p2300_p5), 24, %s1960_s25 }
  0x58   : > { %s374_s22 = scalar_lea.vmem (!%p2300_p5), [#allocation2], %s1404_s30 }
  0x5c   : > { %1713 = dma.done.wait (%p2301_p0), %s371_s23, 384  }
  0x5d   : > { %1715 = vsyncadd (%p2301_p0), %s371_s23, 4294966912  ;;  %p2302_p1 = scmp.eq.s32.totalorder %s1843_s17, 0 }
  0x5f   : > { %1717 = dma.done.wait (%p2302_p1), [#allocation6], 1536   ;;  %p2303_p13 = pmov %p2302_p1 }
  0x60   : > { %v1752_v0 = vmov 0.0|0.0   ;;  %vm1753_vm0 = vmmov 0   ;;  %v1754_v1 = vmov 0.0   ;;  %v1978_v2 = vld [vmem:[%s374_s22] sm:$0xff]  ;;  %v544_v3 = vld [vmem:[%s374_s22 + $0x8] sm:$0xff]  ;;  %s1755_s19 = smov 38   ;;  %v797_v35 = vlaneseq }
  0x61   : > { %1719 = vsyncadd (%p2303_p13), [#allocation6], 4294965760  ;;  %1326 = vmatprep.subr.bf16.mxu0 %v1752_v0  ;;  %1345 = vmatprep.subr.bf16.mxu1 %v1752_v0  ;;  %s1756_s21 = smov 76   ;;  %v443_v4 = vld [vmem:[#allocation5] sm:$0xff]  ;;  %v444_v5 = vld [vmem:[#allocation5 + $0x8] sm:$0xff]  ;;  %s1757_s24 = smov 114  }
  0x62   : > { %1242 = vmatprep.mubr.msk.f32.mxu0 %vm1753_vm0, %v1754_v1  ;;  %1269 = vmatprep.mubr.msk.f32.mxu1 %vm1753_vm0, %v1754_v1  ;;  %v445_v6 = vld [vmem:[#allocation5 + $0x10] sm:$0xff]  ;;  %v628_v7 = vld [vmem:[%s374_s22 + $0x10] sm:$0xff]  ;;  %v1981_v8 = vpack.c.bf16 %v444_v5, %v443_v4  ;;  %v448_v12 = vld [vmem:[#allocation5 + $0x28] sm:$0xff]  ;;  %p439_p4 = scmp.lt.s32.totalorder %s1843_s17, 1  ;;  %vm467_vm1 = vcmask 1041408   ;;  %v1758_v22 = vmov 0  }
  0x63   : > { %547 = vrot.lane.b32.xlu0 %v1978_v2, %s1755_s19  ;;  %631 = vrot.lane.b32.xlu1 %v544_v3, %s1756_s21  ;;  %v446_v9 = vld [vmem:[#allocation5 + $0x18] sm:$0xff]  ;;  %v447_v11 = vld [vmem:[#allocation5 + $0x20] sm:$0xff]  ;;  %v449_v14 = vld [vmem:[#allocation5 + $0x30] sm:$0xff]  ;;  %v1759_v23 = vmov 1   ;;  %vm1760_vm2 = vmmov 1   ;;  %vm463_vm4 = vcmask 736256  }
  0x64   : > { %1328 = vmatpush3.bf16.msra.mxu0 %v1981_v8  ;;  %v1984_v10 = vpack.c.bf16 %v446_v9, %v445_v6  ;;  %1347 = vmatpush3.bf16.msra.mxu1 %v1981_v8  ;;  %v1990_v13 = vpack.c.bf16 %v448_v12, %v447_v11  ;;  %v450_v15 = vld [vmem:[#allocation5 + $0x38] sm:$0xff]  ;;  %v451_v17 = vld [vmem:[#allocation5 + $0x40] sm:$0xff]  ;;  %v452_v18 = vld [vmem:[#allocation5 + $0x48] sm:$0xff]  ;;  %s440_s26 = scalar_select %p439_p4, %s1843_s17, 1  ;;  %v1761_v27 = vmov 2   ;;  %vm551_vm5 = vcmask 310272  }
  0x65   : > { %1329 = vmatprep.subr.bf16.mxu0 %v1752_v0  ;;  %1348 = vmatprep.subr.bf16.mxu1 %v1752_v0  ;;  %v1996_v16 = vpack.c.bf16 %v450_v15, %v449_v14  ;;  %v2002_v19 = vpack.c.bf16 %v452_v18, %v451_v17  ;;  %v453_v20 = vld [vmem:[#allocation5 + $0x50] sm:$0xff]  ;;  %v454_v21 = vld [vmem:[#allocation5 + $0x58] sm:$0x3]  ;;  %vm2012_vm3 = vmpackc.low %vm467_vm1, %vm1760_vm2  ;;  %vm635_vm6 = vcmask 621568   ;;  %v798_v37 = vshrl.u32 %v797_v35, 7  ;;  %s2066_s23 = sshll.u32 %s1960_s25, 3 }
  0x66   : > { %1494 = vset.pattern.permute.xlu1 %v1758_v22  ;;  %1495 = vset.pattern.permute.xlu0 %v1759_v23  ;;  %v1342_v24 = vpack.c.bf16 %v454_v21, %v453_v20  ;;  %s1143_s18 = sshll.u32 %s440_s26, 3  ;;  %v790_v38 = vld [vmem:[%s2272_s4] sm:$0x7]  ;;  %s2286_s22 = scalar_lea.vmem [#allocation13], %s2066_s23 }
  0x67   : > { %549 = vrot.lane.b32.xlu0 %v544_v3, %s1755_s19  ;;  %633 = vrot.lane.b32.xlu1 %v628_v7, %s1756_s21  ;;  %s442_s20 = scalar_lea.vmem %s2269_s1, %s1143_s18  ;;  %v799_v39 = vsub.s32 0, %v798_v37  ;;  %v808_v40 = vsub.s32 1, %v798_v37  ;;  %v818_v41 = vsub.s32 2, %v798_v37  ;;  %v1153_v51 = vld [vmem:[%s2273_s5] ss:$0 sm:$0xff]  ;;  %s410_s26 = scalar_lea.vmem [#allocation7], %s2066_s23 }
  0x68   : > { %1331 = vmatpush3.bf16.msra.mxu0 %v1984_v10  ;;  %1350 = vmatpush3.bf16.msra.mxu1 %v1984_v10  ;;  %v789_v26 = vld [vmem:[%s442_s20] sm:$0xff]  ;;  %s865_s18 = sshll.u32 %s410_s26, 4  ;;  %s832_s12 = scalar_lea.sflag [#allocation4], %s1960_s25  ;;  %s2087_s18 = int_to_ptr.vmem [resolvable:$true] %s865_s18 }
  0x69   : > { %1332 = vmatprep.subr.bf16.mxu0 %v1752_v0  ;;  %1351 = vmatprep.subr.bf16.mxu1 %v1752_v0  ;;  %v800_v44 = vrot.slane %v790_v38, %v799_v39  ;;  %v809_v45 = vrot.slane %v790_v38, %v808_v40  ;;  %v819_v46 = vrot.slane %v790_v38, %v818_v41  ;;  %v2074_v55 = vld [vmem:[%s2271_s3] ss:$0 sm:$0xff]  ;;  %s1556_s28 = scalar_lea.vmem %s2087_s18, 128  ;;  %s1762_s2 = smov [#allocation7]  }
  0x6a   : > { %p1557_p6 = scmp.ne.s32.totalorder %s2087_s18, %s1556_s28  ;;  %s1560_s30 = sshll.u32 %s1762_s2, 4  ;;  %s1561_s30 = int_to_ptr.vmem [resolvable:$false] %s1560_s30 }
  0x6b   : > { %713 = vrot.lane.b32.xlu0 %v628_v7, %s1757_s24  ;;  %794 = vperm.xlu1 %1494, %v789_v26   ;;  %s2077_s24 = sshll.u32 %s1843_s17, 7  ;;  %s1562_s19 = scalar_lea.vmem %s1561_s30, 256 }
  0x6c   : > { %1334 = vmatpush3.bf16.msra.mxu0 %v1990_v13  ;;  %1353 = vmatpush3.bf16.msra.mxu1 %v1990_v13  ;;  %s2085_s20 = scalar_lea.hbm %s2274_s6, %s2077_s24  ;;  %p1558_p8 = pnand %p1557_p6, %p1915_p12 }
  0x6d   : > { %1335 = vmatprep.subr.bf16.mxu0 %v1752_v0  ;;  %1354 = vmatprep.subr.bf16.mxu1 %v1752_v0  ;;  %p1563_p11 = scmp.lt.s32.totalorder %s2087_s18, %s1561_s30  ;;  %p1564_p3 = scmp.lt.s32.totalorder %s1562_s19, %s1556_s28 }
  0x6e   : > { %p1559_p10 = pneg %p1558_p8 }
  0x6f   : > { %803 = vperm.xlu0 %1495, %v789_v26   ;;  %1496 = vset.pattern.permute.xlu1 %v1761_v27  ;;  %p1565_p7 = por %p1564_p3, %p1563_p11 }
  0x70   : > { %1337 = vmatpush3.bf16.msra.mxu0 %v1996_v16  ;;  %1356 = vmatpush3.bf16.msra.mxu1 %v1996_v16 }
  0x71   : > { %1338 = vmatprep.subr.bf16.mxu0 %v1752_v0  ;;  %1357 = vmatprep.subr.bf16.mxu1 %v1752_v0  ;;  %p1566_p9 = pnand %p1565_p7, %p1559_p10 }
  0x72   : > { %813 = vperm.xlu1 %1496, %v789_v26  }
  0x73   : > { %1497 = vset.pattern.permute.xlu0 %v1761_v27 }
  0x74   : > { %1340 = vmatpush3.bf16.msra.mxu0 %v2002_v19  ;;  %1359 = vmatpush3.bf16.msra.mxu1 %v2002_v19 }
  0x75   : > { %1341 = vmatprep.subr.bf16.mxu0 %v1752_v0  ;;  %1360 = vmatprep.subr.bf16.mxu1 %v1752_v0 }
  0x78   : > { %1344 = vmatpush3.bf16.msk.msra.mxu0 %vm2012_vm3, %v1342_v24  ;;  %1363 = vmatpush3.bf16.msk.msra.mxu1 %vm2012_vm3, %v1342_v24 }
  0x79   : > { %1364 = vmatprep.subr.bf16.mxu0 %v1752_v0  ;;  %1383 = vmatprep.subr.bf16.mxu1 %v1752_v0 }
  0x7b   : > { %1243 = vmatmul.mubr.msk.f32.vlgmr.msra.gmra.mrb[0].mxu0 %vm463_vm4, %v1978_v2 }
  0x7c   : > { %1366 = vmatpush3.bf16.msra.mxu0 %v1981_v8  ;;  %1296 = vmatprep.mubr.msk.f32.mxu0 %vm1753_vm0, %v1754_v1 }
  0x7d   : > { %1367 = vmatprep.subr.bf16.mxu0 %v1752_v0 }
  0x80   : > { %1369 = vmatpush3.bf16.msra.mxu0 %v1984_v10 }
  0x81   : > { %1370 = vmatprep.subr.bf16.mxu0 %v1752_v0 }
  0x84   : > { %1372 = vmatpush3.bf16.msra.mxu0 %v1990_v13 }
  0x85   : > { %1373 = vmatprep.subr.bf16.mxu0 %v1752_v0 }
  0x88   : > { %1375 = vmatpush3.bf16.msra.mxu0 %v1996_v16 }
  0x89   : > { %1376 = vmatprep.subr.bf16.mxu0 %v1752_v0 }
  0x8c   : > { %1378 = vmatpush3.bf16.msra.mxu0 %v2002_v19 }
  0x8d   : > { %1379 = vmatprep.subr.bf16.mxu0 %v1752_v0 }
  0x90   : > { %1382 = vmatpush3.bf16.msk.msra.mxu0 %vm2012_vm3, %v1342_v24 }
  0xd5   : > { %v548_v28 = vpop.permute.xlu0 %547  ;;  %v632_v29 = vpop.permute.xlu1 %631 }
  0xd9   : > { %v550_v30 = vpop.permute.xlu0 %549  ;;  %v634_v31 = vpop.permute.xlu1 %633 }
  0xda   : > { %v552_v32 = vsel %vm551_vm5, %v548_v28, %v550_v30  ;;  %v636_v33 = vsel %vm635_vm6, %v632_v29, %v634_v31 }
  0xdb   : > { %1270 = vmatmul.mubr.msk.f32.vlgmr.msra.gmra.mrb[0].mxu1 %vm463_vm4, %v552_v32  ;;  %1297 = vmatmul.mubr.msk.f32.vlgmr.msra.gmra.mrb[2].mxu0 %vm463_vm4, %v636_v33 }
  0xdc   : > { %1385 = vmatpush3.bf16.msra.mxu1 %v1981_v8  ;;  %1323 = vmatprep.mubr.msk.f32.mxu1 %vm1753_vm0, %v1754_v1 }
  0xdd   : > { %1386 = vmatprep.subr.bf16.mxu1 %v1752_v0  ;;  %v714_v34 = vpop.permute.xlu0 %713 }
  0xe0   : > { %1388 = vmatpush3.bf16.msra.mxu1 %v1984_v10 }
  0xe1   : > { %1389 = vmatprep.subr.bf16.mxu1 %v1752_v0 }
  0xe4   : > { %1391 = vmatpush3.bf16.msra.mxu1 %v1990_v13 }
  0xe5   : > { %1392 = vmatprep.subr.bf16.mxu1 %v1752_v0 }
  0xe8   : > { %1394 = vmatpush3.bf16.msra.mxu1 %v1996_v16 }
  0xe9   : > { %1395 = vmatprep.subr.bf16.mxu1 %v1752_v0 }
  0xea   : > { %v795_v36 = vpop.permute.xlu1 %794 }
  0xeb   : > { %v801_v47 = vmul.f32 %v800_v44, %v795_v36 }
  0xec   : > { %1397 = vmatpush3.bf16.msra.mxu1 %v2002_v19 }
  0xed   : > { %1398 = vmatprep.subr.bf16.mxu1 %v1752_v0 }
  0xee   : > { %v804_v42 = vpop.permute.xlu0 %803 }
  0xef   : > { %v810_v48 = vmul.f32 %v809_v45, %v804_v42 }
  0xf0   : > { %1401 = vmatpush3.bf16.msk.msra.mxu1 %vm2012_vm3, %v1342_v24 }
  0xf1   : > { %v814_v43 = vpop.permute.xlu1 %813  ;;  %v811_v50 = vadd.f32 %v810_v48, %v801_v47 }
  0xf2   : > { %v820_v49 = vmul.f32 %v819_v46, %v814_v43 }
  0xf3   : > { %1324 = vmatmul.mubr.msk.f32.vlgmr.msra.gmra.mrb[2].mxu1 %vm463_vm4, %v714_v34 }
  0xf4   : > { %v821_v52 = vadd.f32 %v820_v49, %v811_v50 }
  0xf6   : > { %v828_v53 = vadd.f32 %v1153_v51, %v821_v52 }
  0xf8   : > { %v829_v54 = vmax.f32 %v828_v53, 0.0 }
  0xfa   : > { %830 = vst [vmem:[%s2286_s22] sm:$0xff] %v829_v54 }
 0x14e   : > { %v537_v56 = vpop.f32.mrb[0].mxu0 }
 0x14f   : > { %v538_v57 = vadd.f32 %v2074_v55, %v537_v56  ;;  %v1244_v58 = vpop.f32.mrb[1].mxu0 }
 0x151   : > { %v541_v59 = vmax.f32 %v538_v57, 0.0 }
 0x153   : > { %542 = vst [vmem:[%s410_s26] sm:$0xff] %v541_v59 }
 0x154   : > { %1569 = shalt.err (!%p1566_p9)
}
 0x155   : > { %s1570_s25 = scalar_lea.hbm %s2085_s20, 128  ;;  %s1574_s29 = scalar_lea.hbm %s2274_s6, 256 }
 0x156   : > { %p1571_p2 = scmp.ne.s32.totalorder %s2085_s20, %s1570_s25  ;;  %p1575_p1 = scmp.lt.u32.totalorder %s2085_s20, %s2274_s6 }
 0x157   : > { %p1576_p13 = scmp.lt.u32.totalorder %s1574_s29, %s1570_s25  ;;  %p1578_p6 = scmp.lt.u32.totalorder %s1570_s25, %s2085_s20 }
 0x158   : > { %p1572_p5 = pnand %p1571_p2, %p1915_p12 }
 0x159   : > { %p1577_p4 = por %p1576_p13, %p1575_p1 }
 0x15a   : > { %p1573_p0 = pneg %p1572_p5 }
 0x15b   : > { %p1579_p8 = por %p1578_p6, %p1577_p4 }
 0x15d   : > { %p1580_p10 = pnand %p1579_p8, %p1573_p0 }
 0x15f   : > { %1583 = shalt.err (!%p1580_p10)
}
 0x160   : > { %1411 = dma.vmem_to_hbm [thread:$0]  (%p1915_p12), %s2087_s18, 128, %s2085_s20, %s832_s12  }
 0x161   : > { %s2287_s28 = sand.u32 1, %s1843_s17   ;;  %s417_s30 = scalar_lea.vmem [#allocation8], %s2066_s23 }
 0x162   : > { %s878_s19 = sshll.u32 %s417_s30, 4  ;;  %s424_s25 = scalar_lea.vmem [#allocation10], %s2066_s23  ;;  %s2122_s19 = int_to_ptr.vmem [resolvable:$true] %s878_s19 }
 0x163   : > { %s891_s21 = sshll.u32 %s424_s25, 4  ;;  %s2120_s20 = scalar_lea.hbm %s2275_s7, %s2077_s24  ;;  %s2130_s21 = int_to_ptr.vmem [resolvable:$true] %s891_s21 }
 0x164   : > { %s2128_s27 = scalar_lea.hbm %s2276_s8, %s2077_s24  ;;  %s2134_s2 = scalar_lea.sflag [#allocation9], %s2287_s28 }
 0x165   : > { %s1584_s26 = scalar_lea.vmem %s2122_s19, 128  ;;  %s1763_s18 = smov [#allocation8]  }
 0x166   : > { %p1585_p11 = scmp.ne.s32.totalorder %s2122_s19, %s1584_s26  ;;  %s1588_s22 = sshll.u32 %s1763_s18, 4  ;;  %s1589_s22 = int_to_ptr.vmem [resolvable:$false] %s1588_s22 }
 0x167   : > { %s1590_s12 = scalar_lea.vmem %s1589_s22, 256  ;;  %p1591_p9 = scmp.lt.s32.totalorder %s2122_s19, %s1589_s22 }
 0x168   : > { %p1586_p3 = pnand %p1585_p11, %p1915_p12  ;;  %p1592_p2 = scmp.lt.s32.totalorder %s1590_s12, %s1584_s26 }
 0x16a   : > { %p1587_p7 = pneg %p1586_p3  ;;  %p1593_p5 = por %p1592_p2, %p1591_p9 }
 0x16c   : > { %p1594_p0 = pnand %p1593_p5, %p1587_p7 }
 0x1ae   : > { %v621_v60 = vpop.f32.mrb[0].mxu1  ;;  %v705_v61 = vpop.f32.mrb[2].mxu0 }
 0x1af   : > { %v622_v62 = vadd.f32 %v2074_v55, %v621_v60  ;;  %v1271_v63 = vpop.f32.mrb[1].mxu1  ;;  %v706_v0 = vadd.f32 %v2074_v55, %v705_v61  ;;  %v1298_v1 = vpop.f32.mrb[3].mxu0 }
 0x1b1   : > { %v625_v2 = vmax.f32 %v622_v62, 0.0  ;;  %v709_v3 = vmax.f32 %v706_v0, 0.0 }
 0x1b3   : > { %626 = vst [vmem:[%s417_s30] sm:$0xff] %v625_v2  ;;  %710 = vst [vmem:[%s424_s25] sm:$0xff] %v709_v3 }
 0x1b4   : > { %1597 = shalt.err (!%p1594_p0)
}
 0x1b5   : > { %s1598_s30 = scalar_lea.hbm %s2120_s20, 128  ;;  %s1602_s18 = scalar_lea.hbm %s2275_s7, 256 }
 0x1b6   : > { %p1599_p1 = scmp.ne.s32.totalorder %s2120_s20, %s1598_s30  ;;  %p1603_p6 = scmp.lt.u32.totalorder %s2120_s20, %s2275_s7 }
 0x1b7   : > { %p1604_p8 = scmp.lt.u32.totalorder %s1602_s18, %s1598_s30  ;;  %p1606_p11 = scmp.lt.u32.totalorder %s1598_s30, %s2120_s20 }
 0x1b8   : > { %p1600_p13 = pnand %p1599_p1, %p1915_p12 }
 0x1b9   : > { %p1605_p10 = por %p1604_p8, %p1603_p6 }
 0x1ba   : > { %p1601_p4 = pneg %p1600_p13 }
 0x1bb   : > { %p1607_p3 = por %p1606_p11, %p1605_p10 }
 0x1bd   : > { %p1608_p7 = pnand %p1607_p3, %p1601_p4 }
 0x1bf   : > { %1611 = shalt.err (!%p1608_p7)
}
 0x1c0   : > { %1412 = dma.vmem_to_hbm [thread:$0]  (%p1915_p12), %s2122_s19, 128, %s2120_s20, %s2134_s2  }
 0x1c1   : > { %s1612_s26 = scalar_lea.vmem %s2130_s21, 128  ;;  %s1764_s28 = smov [#allocation10]  }
 0x1c2   : > { %p1613_p9 = scmp.ne.s32.totalorder %s2130_s21, %s1612_s26  ;;  %s1616_s12 = sshll.u32 %s1764_s28, 4  ;;  %s1617_s12 = int_to_ptr.vmem [resolvable:$false] %s1616_s12 }
 0x1c3   : > { %s1618_s30 = scalar_lea.vmem %s1617_s12, 256  ;;  %p1619_p0 = scmp.lt.s32.totalorder %s2130_s21, %s1617_s12 }
 0x1c4   : > { %p1614_p2 = pnand %p1613_p9, %p1915_p12  ;;  %p1620_p1 = scmp.lt.s32.totalorder %s1618_s30, %s1612_s26 }
 0x1c6   : > { %p1615_p5 = pneg %p1614_p2  ;;  %p1621_p13 = por %p1620_p1, %p1619_p0 }
 0x1c8   : > { %p1622_p4 = pnand %p1621_p13, %p1615_p5 }
 0x1ca   : > { %1625 = shalt.err (!%p1622_p4)
}
 0x1cb   : > { %s1626_s19 = scalar_lea.hbm %s2128_s27, 128  ;;  %s1630_s29 = scalar_lea.hbm %s2276_s8, 256 }
 0x1cc   : > { %p1627_p6 = scmp.ne.s32.totalorder %s2128_s27, %s1626_s19  ;;  %p1631_p11 = scmp.lt.u32.totalorder %s2128_s27, %s2276_s8 }
 0x1cd   : > { %p1632_p3 = scmp.lt.u32.totalorder %s1630_s29, %s1626_s19  ;;  %p1634_p9 = scmp.lt.u32.totalorder %s1626_s19, %s2128_s27 }
 0x1ce   : > { %p1628_p8 = pnand %p1627_p6, %p1915_p12 }
 0x1cf   : > { %p1633_p7 = por %p1632_p3, %p1631_p11 }
 0x1d0   : > { %p1629_p10 = pneg %p1628_p8 }
 0x1d1   : > { %p1635_p2 = por %p1634_p9, %p1633_p7 }
 0x1d3   : > { %p1636_p5 = pnand %p1635_p2, %p1629_p10 }
 0x1d5   : > { %1639 = shalt.err (!%p1636_p5)
}
 0x1d6   : > { %1413 = dma.vmem_to_hbm [thread:$0]  (%p1915_p12), %s2130_s21, 128, %s2128_s27, %s2134_s2   ;;  %v783_v4 = vpop.f32.mrb[2].mxu1 }
 0x1d7   : > { %s431_s26 = scalar_lea.vmem [#allocation11], %s2066_s23  ;;  %v784_v5 = vadd.f32 %v2074_v55, %v783_v4  ;;  %v1325_v6 = vpop.f32.mrb[3].mxu1  ;;  %s2306_s12 = scalar_lea.vmem [#allocation13], %s2066_s23 }
 0x1d8   : > { %s904_s28 = sshll.u32 %s431_s26, 4  ;;  %s917_s30 = sshll.u32 %s2306_s12, 4  ;;  %s2190_s28 = int_to_ptr.vmem [resolvable:$true] %s904_s28  ;;  %s2198_s30 = int_to_ptr.vmem [resolvable:$true] %s917_s30 }
 0x1d9   : > { %v787_v7 = vmax.f32 %v784_v5, 0.0  ;;  %s2188_s25 = scalar_lea.hbm %s2277_s9, %s2077_s24  ;;  %s2196_s21 = scalar_lea.hbm %s2278_s10, %s2077_s24 }
 0x1da   : > { %s2307_s23 = sand.u32 1, %s1843_s17   ;;  %s1640_s2 = scalar_lea.vmem %s2190_s28, 128 }
 0x1db   : > { %788 = vst [vmem:[%s431_s26] sm:$0xff] %v787_v7  ;;  %s2202_s27 = scalar_lea.sflag [#allocation12], %s2307_s23  ;;  %p1641_p0 = scmp.ne.s32.totalorder %s2190_s28, %s1640_s2 }
 0x1dc   : > { %s1765_s22 = smov [#allocation11]  }
 0x1dd   : > { %p1642_p1 = pnand %p1641_p0, %p1915_p12  ;;  %s1644_s12 = sshll.u32 %s1765_s22, 4  ;;  %s1645_s12 = int_to_ptr.vmem [resolvable:$false] %s1644_s12 }
 0x1de   : > { %s1646_s19 = scalar_lea.vmem %s1645_s12, 256  ;;  %p1647_p4 = scmp.lt.s32.totalorder %s2190_s28, %s1645_s12 }
 0x1df   : > { %p1643_p13 = pneg %p1642_p1  ;;  %p1648_p6 = scmp.lt.s32.totalorder %s1646_s19, %s1640_s2 }
 0x1e1   : > { %p1649_p8 = por %p1648_p6, %p1647_p4 }
 0x1e3   : > { %p1650_p10 = pnand %p1649_p8, %p1643_p13 }
 0x1e5   : > { %1653 = shalt.err (!%p1650_p10)
}
 0x1e6   : > { %s1654_s17 = scalar_lea.hbm %s2188_s25, 128  ;;  %s1658_s20 = scalar_lea.hbm %s2277_s9, 256 }
 0x1e7   : > { %p1655_p11 = scmp.ne.s32.totalorder %s2188_s25, %s1654_s17  ;;  %p1659_p9 = scmp.lt.u32.totalorder %s2188_s25, %s2277_s9 }
 0x1e8   : > { %p1660_p2 = scmp.lt.u32.totalorder %s1658_s20, %s1654_s17  ;;  %p1662_p0 = scmp.lt.u32.totalorder %s1654_s17, %s2188_s25 }
 0x1e9   : > { %p1656_p3 = pnand %p1655_p11, %p1915_p12 }
 0x1ea   : > { %p1661_p5 = por %p1660_p2, %p1659_p9 }
 0x1eb   : > { %p1657_p7 = pneg %p1656_p3 }
 0x1ec   : > { %p1663_p1 = por %p1662_p0, %p1661_p5 }
 0x1ee   : > { %p1664_p13 = pnand %p1663_p1, %p1657_p7 }
 0x1f0   : > { %1667 = shalt.err (!%p1664_p13)
}
 0x1f1   : > { %1414 = dma.vmem_to_hbm [thread:$0]  (%p1915_p12), %s2190_s28, 128, %s2188_s25, %s2202_s27  }
 0x1f2   : > { %s1668_s23 = scalar_lea.vmem %s2198_s30, 128  ;;  %s1766_s2 = smov [#allocation13]  }
 0x1f3   : > { %p1669_p4 = scmp.ne.s32.totalorder %s2198_s30, %s1668_s23  ;;  %s1672_s22 = sshll.u32 %s1766_s2, 4  ;;  %s1673_s22 = int_to_ptr.vmem [resolvable:$false] %s1672_s22 }
 0x1f4   : > { %s1674_s12 = scalar_lea.vmem %s1673_s22, 256  ;;  %p1675_p10 = scmp.lt.s32.totalorder %s2198_s30, %s1673_s22 }
 0x1f5   : > { %p1670_p6 = pnand %p1669_p4, %p1915_p12  ;;  %p1676_p11 = scmp.lt.s32.totalorder %s1674_s12, %s1668_s23 }
 0x1f7   : > { %p1671_p8 = pneg %p1670_p6  ;;  %p1677_p3 = por %p1676_p11, %p1675_p10 }
 0x1f9   : > { %p1678_p7 = pnand %p1677_p3, %p1671_p8 }
 0x1fb   : > { %1681 = shalt.err (!%p1678_p7)
}
 0x1fc   : > { %s1682_s28 = scalar_lea.hbm %s2196_s21, 128  ;;  %s1686_s17 = scalar_lea.hbm %s2278_s10, 256 }
 0x1fd   : > { %p1683_p9 = scmp.ne.s32.totalorder %s2196_s21, %s1682_s28  ;;  %p1687_p0 = scmp.lt.u32.totalorder %s2196_s21, %s2278_s10 }
 0x1fe   : > { %p1688_p1 = scmp.lt.u32.totalorder %s1686_s17, %s1682_s28  ;;  %p1690_p4 = scmp.lt.u32.totalorder %s1682_s28, %s2196_s21 }
 0x1ff   : > { %p1684_p2 = pnand %p1683_p9, %p1915_p12 }
 0x200   : > { %p1689_p13 = por %p1688_p1, %p1687_p0 }
 0x201   : > { %p1685_p5 = pneg %p1684_p2 }
 0x202   : > { %p1691_p6 = por %p1690_p4, %p1689_p13 }
 0x204   : > { %p1692_p8 = pnand %p1691_p6, %p1685_p5 }
 0x206   : > { %1695 = shalt.err (!%p1692_p8)
}
 0x207   : > { %1415 = dma.vmem_to_hbm [thread:$0]  (%p1915_p12), %s2198_s30, 128, %s2196_s21, %s2202_s27  }
 0x208 PF: > { %s2308_s20 = sld [smem:[#allocation19_spill]]  ;;  %s929_s29 = sand.u32 1, %s1734_s13  }
 0x209   : > { %p2310_p11 = scmp.ge.s32.totalorder %s1746_s16, 2  ;;  %s930_s18 = scalar_lea.sflag [#allocation4], %s929_s29 }
 0x20e   : > { %p2309_p10 = scmp.ne.s32.totalorder %s2308_s20, 0 }
 0x210   : > { %p1430_p3 = pnand %p2310_p11, %p2309_p10 }
 0x212   : > { %1721 = dma.done.wait (!%p1430_p3), %s930_s18, 128  }
 0x213   : > { %1723 = vsyncadd (!%p1430_p3), %s930_s18, 4294967168  ;;  %s2311_s23 = sadd.s32 4294967294, %s1746_s16  }
 0x214   : > { %s938_s2 = sand.u32 1, %s2311_s23  }
 0x215   : > { %s939_s22 = scalar_lea.sflag [#allocation9], %s938_s2 }
 0x216   : > { %1725 = dma.done.wait (!%p1430_p3), %s939_s22, 256  }
 0x217   : > { %1727 = vsyncadd (!%p1430_p3), %s939_s22, 4294967040  ;;  %s957_s11 = scalar_lea.sflag [#allocation12], %s938_s2 }
 0x218   : > { %1729 = dma.done.wait (!%p1430_p3), %s957_s11, 256  }
 0x219   : > { %1731 = vsyncadd (!%p1430_p3), %s957_s11, 4294967040  ;;  %s2312_s16 = sld [smem:[#allocation20_spill]]  ;;  %s2313_s30 = sld [smem:[#allocation21_spill]] }
 0x21a   : > { %s2314_s13 = smov %s1738_s14  ;;  %s2315_s14 = smov %s1742_s15 }
 0x21f   : > { %p31_p12 = scmp.ge.s32.totalorder %s2312_s16, 4   ;;  %s2316_s15 = smov %s2313_s30 }
 0x221   :  { %33 = sbr.rel (!%p31_p12) target bundleno = 12 (0xc), region = 160 }
 0x228   :  { %971 = vsyncpa [#allocation3], 1 }
 0x229   :  { %973 = vsyncpa [#allocation3 + $0x1], 1 }
 0x22a   :  { %974 = vsyncpa [#allocation6], 1 }
 0x22b   :  { %975 = vsyncpa [#allocation4], 1 }
 0x22c   :  { %977 = vsyncpa [#allocation4 + $0x1], 1 }
 0x22d   :  { %978 = vsyncpa [#allocation9], 1 }
 0x22e   :  { %980 = vsyncpa [#allocation9 + $0x1], 1 }
 0x22f   :  { %981 = vsyncpa [#allocation12], 1 }
 0x230   :  { %983 = vsyncpa [#allocation12 + $0x1], 1 }

</bundles_post_ra>
